<compile_context>
chip_gen: v7x
topology: tpu7x:2x2x1
jax: 0.10.0
libtpu: 0.0.40
codegen_flags: <defaults>
</compile_context>

<pallas_src>
import functools

import jax
import jax.numpy as jnp
from jax import lax
from jax.experimental import pallas as pl
from jax.experimental.pallas import tpu as pltpu


_ROW_BLK = 256  # output-row block: caps the live f32 accumulator at 32 vregs


# ----------------------------------------------------------------------------
# Pallas kernel: fused unfold + projection, one image per grid step.
#
#   x_ref: (1, n_pad, c)    bf16  image rows flattened to (h*w [+zero pad], c)
#   w_ref: (k0*k1, c, Gp)   bf16  weight, patch-position-major, G padded to Gp
#   o_ref: (1, n_out, Gp)   f32   n_out = hp*w "wide" rows; columns ow >= wp
#                                 are garbage and are discarded by the wrapper
#
# For the wide flat index t = oh*w + ow (valid when ow < wp):
#   out[t, :] = sum_{i,j}  x_flat[i*w + j + stride*t, :] @ W2[i*k1 + j]
#             = sum_{i,j,ch} x[oh*stride+i, ow*stride+j, ch] * W[ch,(i,j), :]
# i.e. exactly the unfold->matmul of the original module, f32-accumulated on
# the MXU. Each (i,j) term is ONE contiguous (or stride-strided) row window of
# the flat slab -> one (rn, c) @ (c, Gp) matmul per offset per row-block.
# ----------------------------------------------------------------------------
def _fused_unfold_matmul_kernel(x_ref, w_ref, o_ref, *, k0, k1, stride, w, n_out):
    gp = o_ref.shape[-1]
    for r0 in range(0, n_out, _ROW_BLK):                    # static Python loop
        rn = min(_ROW_BLK, n_out - r0)
        acc = jnp.zeros((rn, gp), jnp.float32)
        for i in range(k0):
            for j in range(k1):
                start = i * w + j + stride * r0             # static offset
                if stride == 1:
                    xs = x_ref[0, start:start + rn, :]                     # (rn, c)
                else:
                    xs = x_ref[0, pl.ds(start, rn, stride=stride), :]      # (rn, c)
                acc = acc + jnp.dot(
                    xs, w_ref[i * k1 + j],
                    preferred_element_type=jnp.float32,
                )
        o_ref[0, r0:r0 + rn, :] = acc


def fused_project(x_nchw, w2, *, kernel_size, stride, hp, wp):
    """Fused unfold + linear projection.

    x_nchw: (bs, c, h, w) f32/bf16, w2: (k0*k1, c, Gp) bf16.
    Returns (bs, hp*w, Gp) f32 in the "wide" row layout t = oh*w + ow
    (columns ow >= wp and lanes >= G are garbage/zero, sliced by the caller).
    """
    bs, c, h, w = x_nchw.shape
    k0, k1 = kernel_size
    kk, c2, gp = w2.shape
    assert kk == k0 * k1 and c2 == c

    n_out = hp * w
    # Zero-pad the flat slab so every shifted window stays in bounds:
    # deepest read = (k0-1)*w + (k1-1) + stride*(n_out-1).
    max_row = (k0 - 1) * w + (k1 - 1) + stride * (n_out - 1)
    n_pad = max(h * w, max_row + 1)
    n_pad = ((n_pad + 7) // 8) * 8

    # Cheap layout ops on the *un-expanded* input (1x of x, never the
    # k0*k1-expanded patch matrix): NCHW -> NHWC -> (bs, h*w, c), bf16, pad.
    xt = jnp.transpose(x_nchw, (0, 2, 3, 1)).astype(jnp.bfloat16)
    xt = xt.reshape(bs, h * w, c)
    xt = jnp.pad(xt, ((0, 0), (0, n_pad - h * w), (0, 0)))

    kernel = functools.partial(
        _fused_unfold_matmul_kernel,
        k0=k0, k1=k1, stride=stride, w=w, n_out=n_out,
    )
    return pl.pallas_call(
        kernel,
        out_shape=jax.ShapeDtypeStruct((bs, n_out, gp), jnp.float32),
        grid_spec=pltpu.PrefetchScalarGridSpec(
            num_scalar_prefetch=0,
            grid=(bs,),
            in_specs=[
                pl.BlockSpec((1, n_pad, c), lambda b: (b, 0, 0)),
                # constant index_map -> W is DMA'd into VMEM once and reused.
                pl.BlockSpec((kk, c, gp), lambda b: (0, 0, 0)),
            ],
            out_specs=pl.BlockSpec((1, n_out, gp), lambda b: (b, 0, 0)),
        ),
        compiler_params=pltpu.CompilerParams(
            dimension_semantics=("parallel",),   # v7x: shard batches over 2 TCs
        ),
    )(xt, w2)


# ----------------------------------------------------------------------------
# Reference-only helper: torch.nn.Unfold equivalent (used in the sanity check).
# ----------------------------------------------------------------------------
def unfold_nchw(x, kernel_size, stride):
    """(bs,c,h,w) -> (bs, c*k0*k1, L) with torch's channel-major D ordering."""
    k0, k1 = kernel_size
    bs, c, h, w = x.shape
    hp = (h - k0) // stride + 1
    wp = (w - k1) // stride + 1
    patches = []
    for i in range(k0):
        for j in range(k1):
            patches.append(
                x[:, :, i: i + stride * hp: stride, j: j + stride * wp: stride]
            )
    p = jnp.stack(patches, axis=2)            # (bs, c, k0*k1, hp, wp)
    return p.reshape(bs, c * k0 * k1, hp * wp)


class ConvolutorPallas:
    def __init__(self, in_size, out_channels, kernel_size, stride=1, *, key=None):
        k0, k1 = kernel_size
        c, h, w = in_size
        self.D = c * k0 * k1
        self.hp = (h - k0) // stride + 1
        self.wp = (w - k1) // stride + 1
        self.L = self.hp * self.wp
        self.C = c
        self.K = kernel_size
        self.G = out_channels
        self.stride = stride

        # Deterministic stand-in for the externally attached `Process`
        # (online-PCA projector): linear projection W (D, G), f32.
        if key is None:
            key = jax.random.PRNGKey(42)
        self.W = (
            jax.random.normal(key, (self.D, self.G), dtype=jnp.float32)
            / jnp.sqrt(jnp.float32(self.D))
        )

        # Kernel-side weight: reorder rows from torch-unfold channel-major
        # ordering d = ch*(k0*k1) + i*k1 + j  ->  (i*k1+j, ch) blocks, pad G up
        # to a lane-dense multiple of 128, cast to bf16.
        self.Gp = max(128, ((self.G + 127) // 128) * 128)
        w2 = jnp.transpose(self.W.reshape(c, k0 * k1, self.G), (1, 0, 2))  # (k0*k1, c, G)
        w2 = jnp.pad(w2, ((0, 0), (0, 0), (0, self.Gp - self.G)))
        self.W2 = w2.astype(jnp.bfloat16)

    @functools.partial(jax.jit, static_argnums=0)
    def forward(self, x):
        bs, c, h, w = x.shape
        out = fused_project(
            x, self.W2,
            kernel_size=self.K, stride=self.stride, hp=self.hp, wp=self.wp,
        )                                                   # (bs, hp*w, Gp) f32
        # Drop the wide columns (ow >= wp) and padded lanes, reorder to NCHW.
        # These ops touch only small, un-expanded tensors.
        out = out.reshape(bs, self.hp, w, self.Gp)[:, :, : self.wp, : self.G]
        y = jnp.transpose(out, (0, 3, 1, 2))                # (bs, G, hp, wp)
        return y, None


if __name__ == "__main__":
    key = jax.random.PRNGKey(0)
    k_x, k_w = jax.random.split(key)

    bs, c, h, w = 2, 4, 16, 16
    kernel_size = (3, 3)
    stride = 1
    out_channels = 8

    x = jax.random.normal(k_x, (bs, c, h, w), dtype=jnp.float32)

    conv = ConvolutorPallas((c, h, w), out_channels, kernel_size, stride, key=k_w)
    y, _ = conv.forward(x)
    y = jax.block_until_ready(y)

    # Reference: plain-JAX unfold + matmul + fold, with inputs rounded to bf16
    # exactly as the kernel sees them (accumulation kept in f32).
    x_bf = x.astype(jnp.bfloat16).astype(jnp.float32)
    w_bf = conv.W.astype(jnp.bfloat16).astype(jnp.float32)
    x1_ref = jnp.transpose(
        unfold_nchw(x_bf, kernel_size, stride), (0, 2, 1)
    ).reshape(-1, conv.D)
    y_ref = jnp.dot(x1_ref, w_bf, precision=lax.Precision.HIGHEST)
    y_ref = y_ref.reshape(bs, conv.L, conv.G)
    y_ref = jnp.transpose(y_ref, (0, 2, 1)).reshape(bs, conv.G, conv.hp, conv.wp)

    assert y.shape == (bs, out_channels, conv.hp, conv.wp), y.shape
    max_err = float(jnp.max(jnp.abs(y - y_ref)))
    assert jnp.allclose(y, y_ref, atol=5e-3, rtol=5e-3), max_err
    print("KERNEL_OK")
</pallas_src>

<mosaic_0001>
module attributes {stable_mosaic.version = 11 : i64} {
  func.func @_fused_unfold_matmul_kernel(%arg0: i32, %arg1: memref<1x264x4xbf16, #tpu.memory_space<vmem>>, %arg2: memref<9x4x128xbf16, #tpu.memory_space<vmem>>, %arg3: memref<1x224x128xf32, #tpu.memory_space<vmem>>) attributes {dimension_semantics = [#tpu.dimension_semantics<parallel>], iteration_bounds = array<i64: 2>, scalar_prefetch = 0 : i64, scratch_operands = 0 : i64, tpu.core_type = #tpu.core_type<tc>, window_params = [{transform_indices = @transform_0, window_bounds = array<i64: 1, 264, 4>}, {pipeline_mode = #tpu.pipeline_mode<synchronous>, transform_indices = @transform_1, window_bounds = array<i64: 9, 4, 128>}, {transform_indices = @transform_2, window_bounds = array<i64: 1, 224, 128>}]} {
    %cst = arith.constant 0.000000e+00 : f32
    %0 = vector.broadcast %cst : f32 to vector<224x128xf32>
    %c0 = arith.constant 0 : index
    %c0_0 = arith.constant 0 : index
    %c0_1 = arith.constant 0 : index
    %1 = vector.load %arg1[%c0, %c0_0, %c0_1] : memref<1x264x4xbf16, #tpu.memory_space<vmem>>, vector<1x224x4xbf16>
    %2 = vector.shape_cast %1 : vector<1x224x4xbf16> to vector<224x4xbf16>
    %c0_2 = arith.constant 0 : index
    %c0_3 = arith.constant 0 : index
    %c0_4 = arith.constant 0 : index
    %3 = vector.load %arg2[%c0_2, %c0_3, %c0_4] : memref<9x4x128xbf16, #tpu.memory_space<vmem>>, vector<1x4x128xbf16>
    %4 = vector.shape_cast %3 : vector<1x4x128xbf16> to vector<4x128xbf16>
    %cst_5 = arith.constant dense<0.000000e+00> : vector<224x128xf32>
    %5 = tpu.matmul %2, %4, %cst_5 {dimension_numbers = #tpu.dot_dimension_numbers<[1], [0], [0], [1], [0, 0, 1, 1], [], []>} : vector<224x4xbf16>, vector<4x128xbf16>, vector<224x128xf32> -> vector<224x128xf32>
    %6 = arith.addf %0, %5 : vector<224x128xf32>
    %c0_6 = arith.constant 0 : index
    %c1 = arith.constant 1 : index
    %c0_7 = arith.constant 0 : index
    %7 = vector.load %arg1[%c0_6, %c1, %c0_7] : memref<1x264x4xbf16, #tpu.memory_space<vmem>>, vector<1x224x4xbf16>
    %8 = vector.shape_cast %7 : vector<1x224x4xbf16> to vector<224x4xbf16>
    %c1_8 = arith.constant 1 : index
    %c0_9 = arith.constant 0 : index
    %c0_10 = arith.constant 0 : index
    %9 = vector.load %arg2[%c1_8, %c0_9, %c0_10] : memref<9x4x128xbf16, #tpu.memory_space<vmem>>, vector<1x4x128xbf16>
    %10 = vector.shape_cast %9 : vector<1x4x128xbf16> to vector<4x128xbf16>
    %cst_11 = arith.constant dense<0.000000e+00> : vector<224x128xf32>
    %11 = tpu.matmul %8, %10, %cst_11 {dimension_numbers = #tpu.dot_dimension_numbers<[1], [0], [0], [1], [0, 0, 1, 1], [], []>} : vector<224x4xbf16>, vector<4x128xbf16>, vector<224x128xf32> -> vector<224x128xf32>
    %12 = arith.addf %6, %11 : vector<224x128xf32>
    %c0_12 = arith.constant 0 : index
    %c2 = arith.constant 2 : index
    %c0_13 = arith.constant 0 : index
    %13 = vector.load %arg1[%c0_12, %c2, %c0_13] : memref<1x264x4xbf16, #tpu.memory_space<vmem>>, vector<1x224x4xbf16>
    %14 = vector.shape_cast %13 : vector<1x224x4xbf16> to vector<224x4xbf16>
    %c2_14 = arith.constant 2 : index
    %c0_15 = arith.constant 0 : index
    %c0_16 = arith.constant 0 : index
    %15 = vector.load %arg2[%c2_14, %c0_15, %c0_16] : memref<9x4x128xbf16, #tpu.memory_space<vmem>>, vector<1x4x128xbf16>
    %16 = vector.shape_cast %15 : vector<1x4x128xbf16> to vector<4x128xbf16>
    %cst_17 = arith.constant dense<0.000000e+00> : vector<224x128xf32>
    %17 = tpu.matmul %14, %16, %cst_17 {dimension_numbers = #tpu.dot_dimension_numbers<[1], [0], [0], [1], [0, 0, 1, 1], [], []>} : vector<224x4xbf16>, vector<4x128xbf16>, vector<224x128xf32> -> vector<224x128xf32>
    %18 = arith.addf %12, %17 : vector<224x128xf32>
    %c0_18 = arith.constant 0 : index
    %c16 = arith.constant 16 : index
    %c0_19 = arith.constant 0 : index
    %19 = vector.load %arg1[%c0_18, %c16, %c0_19] : memref<1x264x4xbf16, #tpu.memory_space<vmem>>, vector<1x224x4xbf16>
    %20 = vector.shape_cast %19 : vector<1x224x4xbf16> to vector<224x4xbf16>
    %c3 = arith.constant 3 : index
    %c0_20 = arith.constant 0 : index
    %c0_21 = arith.constant 0 : index
    %21 = vector.load %arg2[%c3, %c0_20, %c0_21] : memref<9x4x128xbf16, #tpu.memory_space<vmem>>, vector<1x4x128xbf16>
    %22 = vector.shape_cast %21 : vector<1x4x128xbf16> to vector<4x128xbf16>
    %cst_22 = arith.constant dense<0.000000e+00> : vector<224x128xf32>
    %23 = tpu.matmul %20, %22, %cst_22 {dimension_numbers = #tpu.dot_dimension_numbers<[1], [0], [0], [1], [0, 0, 1, 1], [], []>} : vector<224x4xbf16>, vector<4x128xbf16>, vector<224x128xf32> -> vector<224x128xf32>
    %24 = arith.addf %18, %23 : vector<224x128xf32>
    %c0_23 = arith.constant 0 : index
    %c17 = arith.constant 17 : index
    %c0_24 = arith.constant 0 : index
    %25 = vector.load %arg1[%c0_23, %c17, %c0_24] : memref<1x264x4xbf16, #tpu.memory_space<vmem>>, vector<1x224x4xbf16>
    %26 = vector.shape_cast %25 : vector<1x224x4xbf16> to vector<224x4xbf16>
    %c4 = arith.constant 4 : index
    %c0_25 = arith.constant 0 : index
    %c0_26 = arith.constant 0 : index
    %27 = vector.load %arg2[%c4, %c0_25, %c0_26] : memref<9x4x128xbf16, #tpu.memory_space<vmem>>, vector<1x4x128xbf16>
    %28 = vector.shape_cast %27 : vector<1x4x128xbf16> to vector<4x128xbf16>
    %cst_27 = arith.constant dense<0.000000e+00> : vector<224x128xf32>
    %29 = tpu.matmul %26, %28, %cst_27 {dimension_numbers = #tpu.dot_dimension_numbers<[1], [0], [0], [1], [0, 0, 1, 1], [], []>} : vector<224x4xbf16>, vector<4x128xbf16>, vector<224x128xf32> -> vector<224x128xf32>
    %30 = arith.addf %24, %29 : vector<224x128xf32>
    %c0_28 = arith.constant 0 : index
    %c18 = arith.constant 18 : index
    %c0_29 = arith.constant 0 : index
    %31 = vector.load %arg1[%c0_28, %c18, %c0_29] : memref<1x264x4xbf16, #tpu.memory_space<vmem>>, vector<1x224x4xbf16>
    %32 = vector.shape_cast %31 : vector<1x224x4xbf16> to vector<224x4xbf16>
    %c5 = arith.constant 5 : index
    %c0_30 = arith.constant 0 : index
    %c0_31 = arith.constant 0 : index
    %33 = vector.load %arg2[%c5, %c0_30, %c0_31] : memref<9x4x128xbf16, #tpu.memory_space<vmem>>, vector<1x4x128xbf16>
    %34 = vector.shape_cast %33 : vector<1x4x128xbf16> to vector<4x128xbf16>
    %cst_32 = arith.constant dense<0.000000e+00> : vector<224x128xf32>
    %35 = tpu.matmul %32, %34, %cst_32 {dimension_numbers = #tpu.dot_dimension_numbers<[1], [0], [0], [1], [0, 0, 1, 1], [], []>} : vector<224x4xbf16>, vector<4x128xbf16>, vector<224x128xf32> -> vector<224x128xf32>
    %36 = arith.addf %30, %35 : vector<224x128xf32>
    %c0_33 = arith.constant 0 : index
    %c32 = arith.constant 32 : index
    %c0_34 = arith.constant 0 : index
    %37 = vector.load %arg1[%c0_33, %c32, %c0_34] : memref<1x264x4xbf16, #tpu.memory_space<vmem>>, vector<1x224x4xbf16>
    %38 = vector.shape_cast %37 : vector<1x224x4xbf16> to vector<224x4xbf16>
    %c6 = arith.constant 6 : index
    %c0_35 = arith.constant 0 : index
    %c0_36 = arith.constant 0 : index
    %39 = vector.load %arg2[%c6, %c0_35, %c0_36] : memref<9x4x128xbf16, #tpu.memory_space<vmem>>, vector<1x4x128xbf16>
    %40 = vector.shape_cast %39 : vector<1x4x128xbf16> to vector<4x128xbf16>
    %cst_37 = arith.constant dense<0.000000e+00> : vector<224x128xf32>
    %41 = tpu.matmul %38, %40, %cst_37 {dimension_numbers = #tpu.dot_dimension_numbers<[1], [0], [0], [1], [0, 0, 1, 1], [], []>} : vector<224x4xbf16>, vector<4x128xbf16>, vector<224x128xf32> -> vector<224x128xf32>
    %42 = arith.addf %36, %41 : vector<224x128xf32>
    %c0_38 = arith.constant 0 : index
    %c33 = arith.constant 33 : index
    %c0_39 = arith.constant 0 : index
    %43 = vector.load %arg1[%c0_38, %c33, %c0_39] : memref<1x264x4xbf16, #tpu.memory_space<vmem>>, vector<1x224x4xbf16>
    %44 = vector.shape_cast %43 : vector<1x224x4xbf16> to vector<224x4xbf16>
    %c7 = arith.constant 7 : index
    %c0_40 = arith.constant 0 : index
    %c0_41 = arith.constant 0 : index
    %45 = vector.load %arg2[%c7, %c0_40, %c0_41] : memref<9x4x128xbf16, #tpu.memory_space<vmem>>, vector<1x4x128xbf16>
    %46 = vector.shape_cast %45 : vector<1x4x128xbf16> to vector<4x128xbf16>
    %cst_42 = arith.constant dense<0.000000e+00> : vector<224x128xf32>
    %47 = tpu.matmul %44, %46, %cst_42 {dimension_numbers = #tpu.dot_dimension_numbers<[1], [0], [0], [1], [0, 0, 1, 1], [], []>} : vector<224x4xbf16>, vector<4x128xbf16>, vector<224x128xf32> -> vector<224x128xf32>
    %48 = arith.addf %42, %47 : vector<224x128xf32>
    %c0_43 = arith.constant 0 : index
    %c34 = arith.constant 34 : index
    %c0_44 = arith.constant 0 : index
    %49 = vector.load %arg1[%c0_43, %c34, %c0_44] : memref<1x264x4xbf16, #tpu.memory_space<vmem>>, vector<1x224x4xbf16>
    %50 = vector.shape_cast %49 : vector<1x224x4xbf16> to vector<224x4xbf16>
    %c8 = arith.constant 8 : index
    %c0_45 = arith.constant 0 : index
    %c0_46 = arith.constant 0 : index
    %51 = vector.load %arg2[%c8, %c0_45, %c0_46] : memref<9x4x128xbf16, #tpu.memory_space<vmem>>, vector<1x4x128xbf16>
    %52 = vector.shape_cast %51 : vector<1x4x128xbf16> to vector<4x128xbf16>
    %cst_47 = arith.constant dense<0.000000e+00> : vector<224x128xf32>
    %53 = tpu.matmul %50, %52, %cst_47 {dimension_numbers = #tpu.dot_dimension_numbers<[1], [0], [0], [1], [0, 0, 1, 1], [], []>} : vector<224x4xbf16>, vector<4x128xbf16>, vector<224x128xf32> -> vector<224x128xf32>
    %54 = arith.addf %48, %53 : vector<224x128xf32>
    %c0_48 = arith.constant 0 : index
    %c0_49 = arith.constant 0 : index
    %c0_50 = arith.constant 0 : index
    %55 = vector.load %arg3[%c0_48, %c0_49, %c0_50] : memref<1x224x128xf32, #tpu.memory_space<vmem>>, vector<1x224x128xf32>
    %56 = vector.shape_cast %55 : vector<1x224x128xf32> to vector<224x128xf32>
    %57 = vector.shape_cast %54 : vector<224x128xf32> to vector<1x224x128xf32>
    tpu.vector_store %arg3[%c0_48, %c0_49, %c0_50], %57 {strides = array<i32>} : memref<1x224x128xf32, #tpu.memory_space<vmem>>, vector<1x224x128xf32>,
    return
  }
  func.func @transform_0(%arg0: i32) -> (i32, i32, i32) {
    %c0_i32 = arith.constant 0 : i32
    %c0_i32_0 = arith.constant 0 : i32
    %c0_i32_1 = arith.constant 0 : i32
    return %arg0, %c0_i32, %c0_i32_0 : i32, i32, i32
  }
  func.func @transform_1(%arg0: i32) -> (i32, i32, i32) {
    %c0_i32 = arith.constant 0 : i32
    %c0_i32_0 = arith.constant 0 : i32
    %c0_i32_1 = arith.constant 0 : i32
    %c0_i32_2 = arith.constant 0 : i32
    return %c0_i32, %c0_i32_0, %c0_i32_1 : i32, i32, i32
  }
  func.func @transform_2(%arg0: i32) -> (i32, i32, i32) {
    %c0_i32 = arith.constant 0 : i32
    %c0_i32_0 = arith.constant 0 : i32
    %c0_i32_1 = arith.constant 0 : i32
    return %arg0, %c0_i32, %c0_i32_0 : i32, i32, i32
  }
}

</mosaic_0001>

<bundles_post_ra>
// kernel: forward.1
= control target key start
LH: loop header
LB: loop body
LE: loop exit
PB: predicated region body
PF: predicated region fallthrough
CT: control target
= control target key end

     0   :  { %s4059_s9 = smov 0   ;;  %s4726_s0 = inlined_call_operand.vmem [shape: bf16[2,264,4], index: 0, kind: input, shape index: {}]   ;;  %s4727_s1 = inlined_call_operand.vmem [shape: bf16[9,4,128], index: 1, kind: input, shape index: {}]   ;;  %s4728_s2 = inlined_call_operand.vmem [shape: f32[2,224,128], index: 2, kind: output, shape index: {}]  }
   0x1 LB: > { %s3090_s10 = sadd.s32 4294967295, %s4042_s9   ;;  %p3094_p0 = scmp.ge.s32.totalorder %s4042_s9, 1  ;;  %s4042_s9 = sphi %s4059_s9, %s12_s9  }
   0x2   : > { %p112_p1 = scmp.lt.s32.totalorder %s4042_s9, 3 }
   0x4   : > { %p113_p2 = pnand %p3094_p0, %p112_p1 }
   0x5   : > { %vm410_vm0 = vcmask (!%p113_p2), 1041408   ;;  %v4070_v0 = vld [vmem:[%s4727_s1 + $0x8] sm:$0x3] (!%p113_p2)  ;;  %v3097_v1 = vld [vmem:[%s4727_s1 + $0x2] sm:$0x3] (!%p113_p2)  ;;  %p134_p3 = scmp.lt.s32.totalorder (!%p113_p2), %s3090_s10, 1 }
   0x6   : > { %116 = sbr.rel (%p113_p2) target bundleno = 496 (0x1f0), region = 28  ;;  %3944 = vmatprep.subr.msk.bf16.mxu0 (!%p113_p2), %vm410_vm0, %v4070_v0  ;;  %3940 = vmatprep.subr.msk.bf16.mxu1 (!%p113_p2), %vm410_vm0, %v3097_v1  ;;  %v4080_v2 = vsel (!%p113_p2), %vm410_vm0, %v4070_v0, 0  ;;  %v412_v3 = vsel (!%p113_p2), %vm410_vm0, %v3097_v1, 0  ;;  %v3216_v4 = vld [vmem:[%s4727_s1 + $0xa] sm:$0x3] (!%p113_p2)  ;;  %vm367_vm2 = vcmask (!%p113_p2), 31744  }
   0x7   : > { %3565 = vmatpush3.bf16.msra.mxu0 (!%p113_p2), %v4080_v2  ;;  %3445 = vmatpush3.bf16.msra.mxu1 (!%p113_p2), %v412_v3  ;;  %v173_v5 = vld [vmem:[%s4727_s1] sm:$0x3] (!%p113_p2)  ;;  %vm250_vm1 = vsmask.f32 (!%p113_p2), 7424  ;;  %v4101_v6 = vsel (!%p113_p2), %vm410_vm0, %v3216_v4, 0  ;;  %vm741_vm3 = vcmask (!%p113_p2), 1046528  }
   0x8   : > { %3946 = vmatprep.subr.msk.bf16.mxu0 (!%p113_p2), %vm410_vm0, %v3216_v4  ;;  %3941 = vmatprep.subr.msk.bf16.mxu1 (!%p113_p2), %vm410_vm0, %v173_v5  ;;  %v588_v12 = vsel (!%p113_p2), %vm410_vm0, %v173_v5, 0  ;;  %v4147_v39 = vld [vmem:[%s4727_s1 + $0x4] sm:$0x3] (!%p113_p2)  ;;  %v4165_v53 = vld [vmem:[%s4727_s1 + $0xc] sm:$0x3] (!%p113_p2) }
   0xd   : > { %s4730_s10 = smov (!%p134_p3, %s3090_s10), 1 }
   0xe   : > { %s3950_s19 = smul.u32 132, %s4730_s10 }
   0xf   : > { %s3951_s5 = smul.u32 224, %s4730_s10 }
  0x10   : > { %s4098_s22 = scalar_lea.vmem %s4726_s0, %s3950_s19 }
  0x11   : > { %v145_v7 = vld [vmem:[%s4098_s22] sm:$0xf]  ;;  %v4105_v8 = vld [vmem:[%s4098_s22 + $0x4] sm:$0xf]  ;;  %v4111_v10 = vld [vmem:[%s4098_s22 + $0x8] sm:$0xff]   ;;  %s4693_s8 = scalar_lea.vmem %s4728_s2, %s3951_s5 }
  0x12   : > { %v4108_v9 = vcombine.low %v145_v7, %v4105_v8  ;;  %v1307_v11 = vld [vmem:[%s4098_s22 + $0x8] sm:$0xf]  ;;  %v4116_v13 = vld [vmem:[%s4098_s22 + $0xc] sm:$0xf]  ;;  %v259_v16 = vshll.u32 %v4111_v10, 16  ;;  %v263_v17 = vshrl.u32 %v4111_v10, 16 }
  0x13   : > { %v4123_v18 = vld [vmem:[%s4098_s22 + $0x10] sm:$0xff]   ;;  %v3187_v20 = vcombine.low %v1307_v11, %v4116_v13  ;;  %v4133_v28 = vld [vmem:[%s4098_s22 + $0x18] sm:$0xff]   ;;  %v4140_v34 = vld [vmem:[%s4098_s22 + $0x20] sm:$0xff]  }
  0x14   : > { %v252_v14 = vshrl.u32 %v4108_v9, 16  ;;  %v254_v15 = vshll.u32 %v4108_v9, 16  ;;  %v4126_v19 = vld [vmem:[%s4098_s22 + $0x10] sm:$0xff]   ;;  %v261_v22 = vrot.slane %v259_v16, 1  ;;  %v1419_v23 = vshll.u32 %v4123_v18, 16  ;;  %v4136_v32 = vld [vmem:[%s4098_s22 + $0x18] sm:$0xff]  }
  0x15   : > { %v1423_v24 = vshrl.u32 %v4123_v18, 16  ;;  %v1412_v25 = vshrl.u32 %v3187_v20, 16  ;;  %v1414_v26 = vshll.u32 %v3187_v20, 16  ;;  %v267_v27 = vshll.u32 %v4126_v19, 16  ;;  %v4155_v48 = vld [vmem:[%s4098_s22 + $0x20] sm:$0xff]   ;;  %v4160_v52 = vld [vmem:[%s4098_s22 + $0x28] sm:$0xff]  }
  0x16   : > { %v256_v21 = vrot.slane %v254_v15, 1  ;;  %v265_v30 = vor.u32 %v263_v17, %v261_v22  ;;  %v1421_v31 = vrot.slane %v1419_v23, 1  ;;  %v271_v33 = vshrl.u32 %v4126_v19, 16  ;;  %v4171_v58 = vld [vmem:[%s4098_s22 + $0x28] sm:$0xff]   ;;  %v4185_v5 = vld [vmem:[%s4098_s22 + $0x30] sm:$0xff]   ;;  %v4200_v23 = vld [vmem:[%s4098_s22 + $0x38] sm:$0xff]  }
  0x17   : > { %v1416_v35 = vrot.slane %v1414_v26, 1  ;;  %v269_v36 = vrot.slane %v267_v27, 1  ;;  %v1427_v37 = vshll.u32 %v4133_v28, 16  ;;  %v1431_v38 = vshrl.u32 %v4133_v28, 16 }
  0x18   : > { %v257_v29 = vor.u32 %v256_v21, %v252_v14  ;;  %v1425_v41 = vor.u32 %v1423_v24, %v1421_v31  ;;  %v275_v42 = vshll.u32 %v4136_v32, 16  ;;  %v1435_v43 = vshll.u32 %v4140_v34, 16  ;;  %v4191_v14 = vld [vmem:[%s4098_s22 + $0x30] sm:$0xff]  }
  0x19   : > { %v1417_v44 = vor.u32 %v1416_v35, %v1412_v25  ;;  %v270_v45 = vsel %vm250_vm1, %v265_v30, %v269_v36  ;;  %v1429_v46 = vrot.slane %v1427_v37, 1  ;;  %v273_v47 = vor.u32 %v271_v33, %v269_v36  ;;  %v4204_v25 = vld [vmem:[%s4098_s22 + $0x38] sm:$0xff]   ;;  %v4213_v36 = vld [vmem:[%s4098_s22 + $0x40] sm:$0xff]  }
  0x1a   : > { %v262_v40 = vsel %vm250_vm1, %v257_v29, %v261_v22  ;;  %v277_v49 = vrot.slane %v275_v42, 1  ;;  %v1437_v50 = vrot.slane %v1435_v43, 1  ;;  %v279_v51 = vshrl.u32 %v4136_v32, 16 }
  0x1b   : > { %3446 = vmatprep.mubr.msk.bf16.mxu1 %vm367_vm2, %v262_v40  ;;  %v1422_v54 = vsel %vm250_vm1, %v1417_v44, %v1421_v31  ;;  %v1430_v55 = vsel %vm250_vm1, %v1425_v41, %v1429_v46  ;;  %v1433_v56 = vor.u32 %v1431_v38, %v1429_v46  ;;  %v283_v57 = vshll.u32 %v4155_v48, 16  ;;  %v4219_v41 = vld [vmem:[%s4098_s22 + $0x40] sm:$0xff]   ;;  %v4224_v46 = vld [vmem:[%s4098_s22 + $0x48] sm:$0xff]  }
  0x1c   : > { %3447 = vmatmul.mubr.msk.bf16.vlgmr.msra.gmra.mrb[0].mxu1 %vm367_vm2, %v270_v45  ;;  %3566 = vmatprep.mubr.msk.bf16.mxu0 %vm367_vm2, %v1422_v54  ;;  %v278_v59 = vsel %vm250_vm1, %v273_v47, %v277_v49  ;;  %v281_v60 = vor.u32 %v279_v51, %v277_v49  ;;  %v1439_v61 = vshrl.u32 %v4140_v34, 16  ;;  %v1443_v62 = vshll.u32 %v4160_v52, 16 }
  0x1d   : > { %3475 = vmatpush3.bf16.msra.mxu1 %v588_v12  ;;  %3567 = vmatmul.mubr.msk.bf16.vlgmr.msra.gmra.mrb[0].mxu0 %vm367_vm2, %v1430_v55  ;;  %v1438_v63 = vsel %vm250_vm1, %v1433_v56, %v1437_v50  ;;  %v285_v1 = vrot.slane %v283_v57, 1  ;;  %v287_v3 = vshrl.u32 %v4155_v48, 16  ;;  %v291_v4 = vshll.u32 %v4171_v58, 16  ;;  %v1745_v57 = vld [vmem:[%s4098_s22 + $0x8] sm:$0xe] }
  0x1e   : > { %3942 = vmatprep.subr.msk.bf16.mxu1 %vm410_vm0, %v4147_v39  ;;  %3450 = vmatprep.mubr.msk.bf16.mxu1 %vm367_vm2, %v278_v59  ;;  %v1441_v7 = vor.u32 %v1439_v61, %v1437_v50  ;;  %v1445_v11 = vrot.slane %v1443_v62, 1  ;;  %v1447_v12 = vshrl.u32 %v4160_v52, 16  ;;  %v295_v15 = vshrl.u32 %v4171_v58, 16  ;;  %v4229_v50 = vld [vmem:[%s4098_s22 + $0x48] sm:$0xff]  }
  0x1f   : > { %3595 = vmatpush3.bf16.msra.mxu0 %v4101_v6  ;;  %3570 = vmatprep.mubr.msk.bf16.mxu0 %vm367_vm2, %v1438_v63  ;;  %v286_v16 = vsel %vm250_vm1, %v281_v60, %v285_v1  ;;  %v289_v17 = vor.u32 %v287_v3, %v285_v1  ;;  %v293_v20 = vrot.slane %v291_v4, 1  ;;  %v1451_v21 = vshll.u32 %v4185_v5, 16  ;;  %v4242_v4 = vld [vmem:[%s4098_s22 + $0x50] sm:$0xff]  }
  0x20   : > { %3947 = vmatprep.subr.msk.bf16.mxu0 %vm410_vm0, %v4165_v53  ;;  %v1449_v6 = vor.u32 %v1447_v12, %v1445_v11  ;;  %v299_v22 = vshll.u32 %v4191_v14, 16  ;;  %v1455_v24 = vshrl.u32 %v4185_v5, 16  ;;  %v303_v29 = vshrl.u32 %v4191_v14, 16 }
  0x21   : > { %v294_v26 = vsel %vm250_vm1, %v289_v17, %v293_v20  ;;  %v1453_v27 = vrot.slane %v1451_v21, 1  ;;  %v1446_v30 = vsel %vm250_vm1, %v1441_v7, %v1445_v11  ;;  %v1459_v33 = vshll.u32 %v4200_v23, 16  ;;  %v4248_v17 = vld [vmem:[%s4098_s22 + $0x58] sm:$0xff]  }
  0x22   : > { %v301_v31 = vrot.slane %v299_v22, 1  ;;  %v307_v35 = vshll.u32 %v4204_v25, 16  ;;  %v297_v38 = vor.u32 %v295_v15, %v293_v20  ;;  %v1463_v40 = vshrl.u32 %v4200_v23, 16 }
  0x23   : > { %v1454_v37 = vsel %vm250_vm1, %v1449_v6, %v1453_v27  ;;  %v1461_v44 = vrot.slane %v1459_v33, 1  ;;  %v1467_v45 = vshll.u32 %v4213_v36, 16  ;;  %v1457_v47 = vor.u32 %v1455_v24, %v1453_v27 }
  0x24   : > { %3451 = vmatmul.mubr.msk.bf16.gmra.mrb[4].mxu1 %vm367_vm2, %v286_v16  ;;  %v305_v42 = vor.u32 %v303_v29, %v301_v31  ;;  %v309_v43 = vrot.slane %v307_v35, 1  ;;  %v315_v49 = vshll.u32 %v4219_v41, 16  ;;  %v302_v51 = vsel %vm250_vm1, %v297_v38, %v301_v31  ;;  %v4265_v35 = vld [vmem:[%s4098_s22 + $0x60] sm:$0xff]   ;;  %v4270_v38 = vld [vmem:[%s4098_s22 + $0x68] sm:$0xff]  }
  0x25   : > { %3454 = vmatprep.mubr.msk.bf16.mxu1 %vm367_vm2, %v294_v26  ;;  %3571 = vmatmul.mubr.msk.bf16.gmra.mrb[4].mxu0 %vm367_vm2, %v1446_v30  ;;  %v1465_v54 = vor.u32 %v1463_v40, %v1461_v44  ;;  %v1469_v55 = vrot.slane %v1467_v45, 1  ;;  %v311_v56 = vshrl.u32 %v4204_v25, 16  ;;  %v319_v60 = vshrl.u32 %v4219_v41, 16 }
  0x26   : > { %3574 = vmatprep.mubr.msk.bf16.mxu0 %vm367_vm2, %v1454_v37  ;;  %v310_v59 = vsel %vm250_vm1, %v305_v42, %v309_v43  ;;  %v323_v61 = vshll.u32 %v4224_v46, 16  ;;  %v1462_v62 = vsel %vm250_vm1, %v1457_v47, %v1461_v44  ;;  %v317_v63 = vrot.slane %v315_v49, 1 }
  0x27   : > { %v1471_v1 = vshrl.u32 %v4213_v36, 16  ;;  %v1475_v3 = vshll.u32 %v4229_v50, 16  ;;  %v1470_v7 = vsel %vm250_vm1, %v1465_v54, %v1469_v55  ;;  %v313_v11 = vor.u32 %v311_v56, %v309_v43 }
  0x28   : > { %v3217_v12 = vcombine.low %v1745_v57, %v4116_v13  ;;  %v321_v15 = vor.u32 %v319_v60, %v317_v63  ;;  %v325_v16 = vrot.slane %v323_v61, 1  ;;  %v331_v6 = vshll.u32 %v4242_v4, 16  ;;  %v4294_v61 = vld [vmem:[%s4727_s1 + $0xe] sm:$0x3] }
  0x29   : > { %v1473_v20 = vor.u32 %v1471_v1, %v1469_v55  ;;  %v4252_v21 = vrot.slane %v1475_v3, 1  ;;  %v318_v22 = vsel %vm250_vm1, %v313_v11, %v317_v63  ;;  %v1752_v13 = vrot.slane %v4123_v18, 1  ;;  %v735_v11 = vld [vmem:[%s4098_s22] sm:$0xe] }
  0x2a   : > { %v1751_v24 = vrot.slane %v3217_v12, 1  ;;  %v327_v26 = vshrl.u32 %v4224_v46, 16  ;;  %v326_v27 = vsel %vm250_vm1, %v321_v15, %v325_v16  ;;  %v335_v29 = vshrl.u32 %v4242_v4, 16 }
  0x2b   : > { %v339_v30 = vshll.u32 %v4248_v17, 16  ;;  %v1478_v31 = vsel %vm250_vm1, %v1473_v20, %v4252_v21  ;;  %v333_v33 = vrot.slane %v331_v6, 1  ;;  %v1754_v43 = vrot.slane %v4133_v28, 1  ;;  %v4284_v28 = vld [vmem:[%s4098_s22 + $0x70] ss:$0 sps:$4 sm:$0x11]  }
  0x2c   : > { %3455 = vmatmul.mubr.msk.bf16.gmra.mrb[8].mxu1 %vm367_vm2, %v302_v51  ;;  %v1753_v18 = vsel %vm741_vm3, %v1751_v24, %v1752_v13  ;;  %v329_v37 = vor.u32 %v327_v26, %v325_v16  ;;  %v1756_v44 = vrot.slane %v4140_v34, 1  ;;  %v347_v45 = vshll.u32 %v4265_v35, 16 }
  0x2d   : > { %3458 = vmatprep.mubr.msk.bf16.mxu1 %vm367_vm2, %v310_v59  ;;  %3575 = vmatmul.mubr.msk.bf16.gmra.mrb[8].mxu0 %vm367_vm2, %v1462_v62  ;;  %v337_v40 = vor.u32 %v335_v29, %v333_v33  ;;  %v341_v42 = vrot.slane %v339_v30, 1  ;;  %v343_v49 = vshrl.u32 %v4248_v17, 16  ;;  %v355_v51 = vshll.u32 %v4270_v38, 16 }
  0x2e   : > { %3578 = vmatprep.mubr.msk.bf16.mxu0 %vm367_vm2, %v1470_v7  ;;  %v334_v47 = vsel %vm250_vm1, %v329_v37, %v333_v33  ;;  %v351_v55 = vshrl.u32 %v4265_v35, 16  ;;  %v743_v56 = vrot.slane %v4111_v10, 1  ;;  %v745_v57 = vrot.slane %v4126_v19, 1 }
  0x2f   : > { %v342_v54 = vsel %vm250_vm1, %v337_v40, %v341_v42  ;;  %v1755_v34 = vsel %vm741_vm3, %v1752_v13, %v1754_v43  ;;  %v2141_v59 = vsel %vm410_vm0, %v4165_v53, 0  ;;  %v349_v60 = vrot.slane %v347_v45, 1  ;;  %v4362_v45 = vld [vmem:[%s4098_s22 + $0x68] sm:$0xff]  }
  0x30   : > { %v1757_v62 = vsel %vm741_vm3, %v1754_v43, %v1756_v44  ;;  %v345_v63 = vor.u32 %v343_v49, %v341_v42  ;;  %v357_v1 = vrot.slane %v355_v51, 1  ;;  %v4301_v3 = vsel %vm741_vm3, %v743_v56, %v745_v57  ;;  %v4348_v42 = vld [vmem:[%s4098_s22 + $0x58] sm:$0xff]   ;;  %v4371_v51 = vld [vmem:[%s4098_s22 + $0x70] sm:$0xff]  }
  0x31   : > { %v353_v7 = vor.u32 %v351_v55, %v349_v60  ;;  %v1758_v53 = vrot.slane %v4160_v52, 1  ;;  %v3142_v12 = vcombine.low %v735_v11, %v4105_v8  ;;  %v1760_v15 = vrot.slane %v4185_v5, 1 }
  0x32   : > { %v359_v16 = vshrl.u32 %v4270_v38, 16  ;;  %v350_v20 = vsel %vm250_vm1, %v345_v63, %v349_v60  ;;  %v363_v6 = vshll.u32 %v4284_v28, 16  ;;  %v1764_v30 = vrot.slane %v4213_v36, 1  ;;  %v3991_v63 = vld [vmem:[%s4098_s22 + $0x10] sm:$0xff]  }
  0x33   : > { %v358_v24 = vsel %vm250_vm1, %v353_v7, %v357_v1  ;;  %v1759_v8 = vsel %vm741_vm3, %v1756_v44, %v1758_v53  ;;  %v1761_v5 = vsel %vm741_vm3, %v1758_v53, %v1760_v15  ;;  %v814_v37 = vsel %vm410_vm0, %v4147_v39, 0  ;;  %v4354_v44 = vld [vmem:[%s4098_s22 + $0x60] sm:$0xff]   ;;  %v4408_v53 = vld [vmem:[%s4727_s1 + $0x10] sm:$0x3] }
  0x34   : > { %3459 = vmatmul.mubr.msk.bf16.gmra.mrb[12].mxu1 %vm367_vm2, %v318_v22  ;;  %v742_v22 = vrot.slane %v3142_v12, 1  ;;  %v361_v13 = vor.u32 %v359_v16, %v357_v1  ;;  %v365_v26 = vrot.slane %v363_v6, 1  ;;  %v1772_v39 = vrot.slane %v4354_v44, 1  ;;  %v3992_v1 = vld [vmem:[%s4098_s22 + $0x18] sm:$0xff]   ;;  %v3993_v7 = vld [vmem:[%s4098_s22 + $0x20] sm:$0xff]   ;;  %v3994_v12 = vld [vmem:[%s4098_s22 + $0x28] sm:$0xff]  }
  0x35   : > { %3462 = vmatprep.mubr.msk.bf16.mxu1 %vm367_vm2, %v326_v27  ;;  %3579 = vmatmul.mubr.msk.bf16.gmra.mrb[12].mxu0 %vm367_vm2, %v1478_v31  ;;  %v1762_v27 = vrot.slane %v4200_v23, 1  ;;  %v1766_v23 = vrot.slane %v4229_v50, 1  ;;  %v1776_v55 = vrot.slane %v4371_v51, 1  ;;  %v2579_v11 = vsel %vm410_vm0, %v4294_v61, 0  ;;  %v3998_v16 = vld [vmem:[%s4098_s22 + $0x40] sm:$0xff]  }
  0x36   : > { %3596 = vmatprep.mubr.msk.bf16.mxu0 %vm367_vm2, %v1753_v18  ;;  %v4316_v52 = vsel %vm741_vm3, %v742_v22, %v743_v56  ;;  %v366_v29 = vsel %vm250_vm1, %v361_v13, %v365_v26  ;;  %v4333_v18 = vld [vmem:[%s4098_s22 + $0x50] sm:$0xff]   ;;  %v4378_v56 = vld [vmem:[%s4098_s22 + $0x78] ss:$0 sps:$4 sm:$0x11]   ;;  %v755_v26 = vrot.slane %v4204_v25, 1 }
  0x37   : > { %v1763_v31 = vsel %vm741_vm3, %v1760_v15, %v1762_v27  ;;  %v1765_v33 = vsel %vm741_vm3, %v1762_v27, %v1764_v30  ;;  %v1768_v36 = vrot.slane %v4333_v18, 1  ;;  %v1767_v40 = vsel %vm741_vm3, %v1764_v30, %v1766_v23  ;;  %v3996_v15 = vld [vmem:[%s4098_s22 + $0x38] sm:$0xff]  }
  0x38   : > { %v1778_v60 = vrot.slane %v4378_v56, 1 }
  0x39   : > { %v1769_v43 = vsel %vm741_vm3, %v1766_v23, %v1768_v36 }
  0x3c   : > { %3463 = vmatmul.mubr.msk.bf16.gmra.mrb[16].mxu1 %vm367_vm2, %v334_v47 }
  0x3d   : > { %3466 = vmatprep.mubr.msk.bf16.mxu1 %vm367_vm2, %v342_v54  ;;  %3597 = vmatmul.mubr.msk.bf16.vlgmr.msra.gmra.mrb[0].mxu0 %vm367_vm2, %v1755_v34  ;;  %v1774_v54 = vrot.slane %v4362_v45, 1 }
  0x3e   : > { %3625 = vmatpush3.bf16.msra.mxu0 %v2141_v59  ;;  %3600 = vmatprep.mubr.msk.bf16.mxu0 %vm367_vm2, %v1757_v62  ;;  %v1779_v62 = vsel %vm741_vm3, %v1776_v55, %v1778_v60 }
  0x3f   : > { %3948 = vmatprep.subr.msk.bf16.mxu0 %vm410_vm0, %v4294_v61  ;;  %v1775_v34 = vsel %vm741_vm3, %v1772_v39, %v1774_v54  ;;  %v1777_v59 = vsel %vm741_vm3, %v1774_v54, %v1776_v55  ;;  %v3995_v61 = vld [vmem:[%s4098_s22 + $0x30] sm:$0xff]  }
  0x44   : > { %3467 = vmatmul.mubr.msk.bf16.gmra.mrb[20].mxu1 %vm367_vm2, %v350_v20  ;;  %v747_v20 = vrot.slane %v4136_v32, 1 }
  0x45   : > { %3470 = vmatprep.mubr.msk.bf16.mxu1 %vm367_vm2, %v358_v24  ;;  %3601 = vmatmul.mubr.msk.bf16.gmra.mrb[4].mxu0 %vm367_vm2, %v1759_v8  ;;  %v3999_v24 = vld [vmem:[%s4098_s22 + $0x48] sm:$0xff]   ;;  %v751_v8 = vrot.slane %v4171_v58, 1 }
  0x46   : > { %3604 = vmatprep.mubr.msk.bf16.mxu0 %vm367_vm2, %v1761_v5  ;;  %v748_v6 = vsel %vm741_vm3, %v745_v57, %v747_v20  ;;  %v4450_v5 = vld [vmem:[%s4098_s22 + $0x14] sm:$0xf] }
  0x4c   : > { %3471 = vmatmul.mubr.msk.bf16.gmra.mrb[24].mxu1 %vm367_vm2, %v366_v29  ;;  %v4463_v29 = vld [vmem:[%s4098_s22 + $0x18] sm:$0xff]  }
  0x4d   : > { %3476 = vmatprep.mubr.msk.bf16.mxu1 %vm367_vm2, %v4108_v9  ;;  %3605 = vmatmul.mubr.msk.bf16.gmra.mrb[8].mxu0 %vm367_vm2, %v1763_v31  ;;  %v3157_v9 = vld [vmem:[%s4727_s1 + $0x6] sm:$0x3] }
  0x4e   : > { %3608 = vmatprep.mubr.msk.bf16.mxu0 %vm367_vm2, %v1765_v33  ;;  %v1132_v22 = vsel %vm410_vm0, %v3157_v9, 0  ;;  %v4003_v33 = vld [vmem:[%s4098_s22 + $0x68] sm:$0xff]  }
  0x54   : > { %3477 = vmatmul.mubr.msk.bf16.vlgmr.msra.gmra.mrb[0].mxu1 %vm367_vm2, %v4111_v10  ;;  %v1770_v10 = vrot.slane %v4348_v42, 1 }
  0x55   : > { %3480 = vmatprep.mubr.msk.bf16.mxu1 %vm367_vm2, %v4126_v19  ;;  %3505 = vmatpush3.bf16.msra.mxu1 %v814_v37  ;;  %v2428_v37 = vshll.u32 %v4463_v29, 16 }
  0x56   : > { %3943 = vmatprep.subr.msk.bf16.mxu1 %vm410_vm0, %v3157_v9  ;;  %3609 = vmatmul.mubr.msk.bf16.gmra.mrb[12].mxu0 %vm367_vm2, %v1767_v40  ;;  %v1771_v47 = vsel %vm741_vm3, %v1768_v36, %v1770_v10  ;;  %v1773_v49 = vsel %vm741_vm3, %v1770_v10, %v1772_v39  ;;  %v759_v9 = vrot.slane %v4224_v46, 1  ;;  %v4475_v40 = vld [vmem:[%s4098_s22 + $0x20] sm:$0xff]  }
  0x57   : > { %3612 = vmatprep.mubr.msk.bf16.mxu0 %vm367_vm2, %v1769_v43  ;;  %v2430_v39 = vrot.slane %v2428_v37, 1  ;;  %v2436_v54 = vshll.u32 %v4475_v40, 16  ;;  %v4013_v37 = vld [vmem:[%s4098_s22 + $0x8] sm:$0xff]  }
  0x5c   : > { %3481 = vmatmul.mubr.msk.bf16.gmra.mrb[4].mxu1 %vm367_vm2, %v4136_v32  ;;  %v749_v32 = vrot.slane %v4155_v48, 1 }
  0x5d   : > { %3484 = vmatprep.mubr.msk.bf16.mxu1 %vm367_vm2, %v4155_v48  ;;  %v4001_v48 = vld [vmem:[%s4098_s22 + $0x58] sm:$0xff]  }
  0x5e   : > { %3613 = vmatmul.mubr.msk.bf16.gmra.mrb[16].mxu0 %vm367_vm2, %v1771_v47  ;;  %v750_v19 = vsel %vm741_vm3, %v747_v20, %v749_v32  ;;  %v752_v57 = vsel %vm741_vm3, %v749_v32, %v751_v8  ;;  %v4480_v47 = vld [vmem:[%s4098_s22 + $0x28] sm:$0xff]   ;;  %v2832_v20 = vsel %vm410_vm0, %v4408_v53, 0 }
  0x5f   : > { %3616 = vmatprep.mubr.msk.bf16.mxu0 %vm367_vm2, %v1773_v49  ;;  %v4005_v49 = vld [vmem:[%s4098_s22 + $0x78] sm:$0xff]   ;;  %v2444_v60 = vshll.u32 %v4480_v47, 16 }
  0x64   : > { %3485 = vmatmul.mubr.msk.bf16.gmra.mrb[8].mxu1 %vm367_vm2, %v4171_v58  ;;  %v4002_v58 = vld [vmem:[%s4098_s22 + $0x60] sm:$0xff]  }
  0x65   : > { %3488 = vmatprep.mubr.msk.bf16.mxu1 %vm367_vm2, %v4191_v14 }
  0x66   : > { %3617 = vmatmul.mubr.msk.bf16.gmra.mrb[20].mxu0 %vm367_vm2, %v1775_v34  ;;  %v761_v34 = vrot.slane %v4242_v4, 1 }
  0x67   : > { %3620 = vmatprep.mubr.msk.bf16.mxu0 %vm367_vm2, %v1777_v59  ;;  %v2440_v59 = vshrl.u32 %v4475_v40, 16 }
  0x6c   : > { %3489 = vmatmul.mubr.msk.bf16.gmra.mrb[12].mxu1 %vm367_vm2, %v4204_v25  ;;  %v757_v25 = vrot.slane %v4219_v41, 1 }
  0x6d   : > { %3492 = vmatprep.mubr.msk.bf16.mxu1 %vm367_vm2, %v4219_v41 }
  0x6e   : > { %3621 = vmatmul.mubr.msk.bf16.gmra.mrb[24].mxu0 %vm367_vm2, %v1779_v62  ;;  %v758_v43 = vsel %vm741_vm3, %v755_v26, %v757_v25  ;;  %v760_v41 = vsel %vm741_vm3, %v757_v25, %v759_v9  ;;  %v763_v62 = vrot.slane %v4248_v17, 1  ;;  %v4536_v25 = vld [vmem:[%s4098_s22 + $0x50] sm:$0xff]  }
  0x6f   : > { %3626 = vmatprep.mubr.msk.bf16.mxu0 %vm367_vm2, %v3991_v63  ;;  %v2438_v63 = vrot.slane %v2436_v54, 1  ;;  %v2488_v54 = vshrl.u32 %v4536_v25, 16 }
  0x74   : > { %3493 = vmatmul.mubr.msk.bf16.gmra.mrb[16].mxu1 %vm367_vm2, %v4224_v46  ;;  %v2432_v46 = vshrl.u32 %v4463_v29, 16 }
  0x75   : > { %3496 = vmatprep.mubr.msk.bf16.mxu1 %vm367_vm2, %v4242_v4  ;;  %v4500_v4 = vld [vmem:[%s4098_s22 + $0x38] sm:$0xff]  }
  0x76   : > { %3627 = vmatmul.mubr.msk.bf16.vlgmr.msra.gmra.mrb[0].mxu0 %vm367_vm2, %v3992_v1  ;;  %v4495_v1 = vld [vmem:[%s4098_s22 + $0x30] sm:$0xff]   ;;  %v2460_v32 = vshll.u32 %v4500_v4, 16 }
  0x77   : > { %3655 = vmatpush3.bf16.msra.mxu0 %v2579_v11  ;;  %3630 = vmatprep.mubr.msk.bf16.mxu0 %vm367_vm2, %v3993_v7  ;;  %v2434_v7 = vor.u32 %v2432_v46, %v2430_v39  ;;  %v762_v11 = vsel %vm741_vm3, %v759_v9, %v761_v34 }
  0x78   : > { %3949 = vmatprep.subr.msk.bf16.mxu0 %vm410_vm0, %v4408_v53 }
  0x7c   : > { %3497 = vmatmul.mubr.msk.bf16.gmra.mrb[20].mxu1 %vm367_vm2, %v4248_v17  ;;  %v2439_v17 = vsel %vm250_vm1, %v2434_v7, %v2438_v63 }
  0x7d   : > { %3500 = vmatprep.mubr.msk.bf16.mxu1 %vm367_vm2, %v4265_v35 }
  0x7e   : > { %3631 = vmatmul.mubr.msk.bf16.gmra.mrb[4].mxu0 %vm367_vm2, %v3994_v12  ;;  %v2442_v12 = vor.u32 %v2440_v59, %v2438_v63  ;;  %v4015_v59 = vld [vmem:[%s4098_s22 + $0x10] sm:$0xff]  }
  0x7f   : > { %3634 = vmatprep.mubr.msk.bf16.mxu0 %vm367_vm2, %v3995_v61  ;;  %v2446_v61 = vrot.slane %v2444_v60, 1 }
  0x84   : > { %3501 = vmatmul.mubr.msk.bf16.gmra.mrb[24].mxu1 %vm367_vm2, %v4270_v38 }
  0x85   : > { %3506 = vmatprep.mubr.msk.bf16.mxu1 %vm367_vm2, %v4316_v52  ;;  %v4000_v52 = vld [vmem:[%s4098_s22 + $0x50] sm:$0xff]  }
  0x86   : > { %3635 = vmatmul.mubr.msk.bf16.gmra.mrb[8].mxu0 %vm367_vm2, %v3996_v15  ;;  %v764_v15 = vsel %vm741_vm3, %v761_v34, %v763_v62  ;;  %v4554_v34 = vld [vmem:[%s4098_s22 + $0x60] sm:$0xff]  }
  0x87   : > { %3638 = vmatprep.mubr.msk.bf16.mxu0 %vm367_vm2, %v3998_v16  ;;  %v2452_v16 = vshll.u32 %v4495_v1, 16 }
  0x8c   : > { %3507 = vmatmul.mubr.msk.bf16.vlgmr.msra.gmra.mrb[0].mxu1 %vm367_vm2, %v4301_v3  ;;  %v2316_v3 = vld [vmem:[%s4098_s22 + $0x10] sm:$0xf] }
  0x8d   : > { %3510 = vmatprep.mubr.msk.bf16.mxu1 %vm367_vm2, %v748_v6  ;;  %3535 = vmatpush3.bf16.msra.mxu1 %v1132_v22  ;;  %v3262_v13 = vcombine.low %v2316_v3, %v4450_v5  ;;  %v2448_v6 = vshrl.u32 %v4480_v47, 16  ;;  %v2447_v22 = vsel %vm250_vm1, %v2442_v12, %v2446_v61  ;;  %v2500_v12 = vshll.u32 %v4554_v34, 16 }
  0x8e   : > { %3945 = vmatprep.subr.msk.bf16.mxu1 %vm410_vm0, %v4070_v0  ;;  %3639 = vmatmul.mubr.msk.bf16.gmra.mrb[12].mxu0 %vm367_vm2, %v3999_v24  ;;  %v753_v0 = vrot.slane %v4191_v14, 1  ;;  %v4004_v14 = vld [vmem:[%s4098_s22 + $0x70] sm:$0xff]   ;;  %v765_v24 = vrot.slane %v4265_v35, 1  ;;  %v2462_v35 = vrot.slane %v2460_v32, 1  ;;  %v4021_v32 = vld [vmem:[%s4098_s22 + $0x28] sm:$0xff]  }
  0x8f   : > { %3642 = vmatprep.mubr.msk.bf16.mxu0 %vm367_vm2, %v4000_v52  ;;  %v2423_v30 = vshll.u32 %v3262_v13, 16  ;;  %v2421_v23 = vshrl.u32 %v3262_v13, 16  ;;  %v2456_v52 = vshrl.u32 %v4495_v1, 16  ;;  %v2450_v53 = vor.u32 %v2448_v6, %v2446_v61 }
  0x90   : > { %v754_v27 = vsel %vm741_vm3, %v751_v8, %v753_v0  ;;  %v756_v31 = vsel %vm741_vm3, %v753_v0, %v755_v26  ;;  %v767_v8 = vrot.slane %v4270_v38, 1  ;;  %v766_v3 = vsel %vm741_vm3, %v763_v62, %v765_v24  ;;  %v4017_v62 = vld [vmem:[%s4098_s22 + $0x18] sm:$0xff]  }
  0x91   : > { %v2425_v36 = vrot.slane %v2423_v30, 1  ;;  %v2464_v26 = vshrl.u32 %v4500_v4, 16  ;;  %v769_v30 = vrot.slane %v4284_v28, 1  ;;  %v4542_v28 = vld [vmem:[%s4098_s22 + $0x58] sm:$0xff]   ;;  %v2502_v6 = vrot.slane %v2500_v12, 1 }
  0x92   : > { %v768_v0 = vsel %vm741_vm3, %v765_v24, %v767_v8  ;;  %v2492_v46 = vshll.u32 %v4542_v28, 16  ;;  %v4019_v24 = vld [vmem:[%s4098_s22 + $0x20] sm:$0xff]  }
  0x93   : > { %v2426_v10 = vor.u32 %v2425_v36, %v2421_v23  ;;  %v2466_v23 = vor.u32 %v2464_v26, %v2462_v35  ;;  %v770_v36 = vsel %vm741_vm3, %v767_v8, %v769_v30  ;;  %v4023_v26 = vld [vmem:[%s4098_s22 + $0x30] sm:$0xff]   ;;  %v4593_v30 = vld [vmem:[%s4098_s22 + $0x80] ss:$0 sps:$4 sm:$0x11]  }
  0x94   : > { %3511 = vmatmul.mubr.msk.bf16.gmra.mrb[4].mxu1 %vm367_vm2, %v750_v19  ;;  %v2454_v19 = vrot.slane %v2452_v16, 1  ;;  %v2494_v7 = vrot.slane %v2492_v46, 1 }
  0x95   : > { %3514 = vmatprep.mubr.msk.bf16.mxu1 %vm367_vm2, %v752_v57  ;;  %v2431_v55 = vsel %vm250_vm1, %v2426_v10, %v2430_v39  ;;  %v4517_v57 = vld [vmem:[%s4098_s22 + $0x40] sm:$0xff]   ;;  %v2484_v10 = vshll.u32 %v4536_v25, 16 }
  0x96   : > { %3643 = vmatmul.mubr.msk.bf16.gmra.mrb[16].mxu0 %vm367_vm2, %v4001_v48  ;;  %v2458_v48 = vor.u32 %v2456_v52, %v2454_v19  ;;  %v2468_v38 = vshll.u32 %v4517_v57, 16  ;;  %v2455_v13 = vsel %vm250_vm1, %v2450_v53, %v2454_v19 }
  0x97   : > { %3646 = vmatprep.mubr.msk.bf16.mxu0 %vm367_vm2, %v4002_v58  ;;  %v4522_v58 = vld [vmem:[%s4098_s22 + $0x48] sm:$0xff]  }
  0x9c   : > { %3515 = vmatmul.mubr.msk.bf16.gmra.mrb[8].mxu1 %vm367_vm2, %v754_v27  ;;  %v2463_v27 = vsel %vm250_vm1, %v2458_v48, %v2462_v35 }
  0x9d   : > { %3518 = vmatprep.mubr.msk.bf16.mxu1 %vm367_vm2, %v756_v31  ;;  %v2472_v31 = vshrl.u32 %v4517_v57, 16 }
  0x9e   : > { %3647 = vmatmul.mubr.msk.bf16.gmra.mrb[20].mxu0 %vm367_vm2, %v4003_v33  ;;  %v2476_v33 = vshll.u32 %v4522_v58, 16 }
  0x9f   : > { %3650 = vmatprep.mubr.msk.bf16.mxu0 %vm367_vm2, %v4004_v14  ;;  %v2470_v14 = vrot.slane %v2468_v38, 1 }
  0xa1   : > { %v2474_v9 = vor.u32 %v2472_v31, %v2470_v14  ;;  %v2471_v39 = vsel %vm250_vm1, %v2466_v23, %v2470_v14  ;;  %v4025_v31 = vld [vmem:[%s4098_s22 + $0x38] sm:$0xff]   ;;  %v2754_v23 = vld [vmem:[%s4098_s22 + $0x10] sm:$0xe] }
  0xa4   : > { %3519 = vmatmul.mubr.msk.bf16.gmra.mrb[12].mxu1 %vm367_vm2, %v758_v43  ;;  %v2478_v43 = vrot.slane %v2476_v33, 1 }
  0xa5   : > { %3522 = vmatprep.mubr.msk.bf16.mxu1 %vm367_vm2, %v760_v41  ;;  %v2480_v41 = vshrl.u32 %v4522_v58, 16 }
  0xa6   : > { %3651 = vmatmul.mubr.msk.bf16.gmra.mrb[24].mxu0 %vm367_vm2, %v4005_v49  ;;  %v2479_v49 = vsel %vm250_vm1, %v2474_v9, %v2478_v43  ;;  %v2532_v9 = vshll.u32 %v4593_v30, 16 }
  0xa7   : > { %3656 = vmatprep.mubr.msk.bf16.mxu0 %vm367_vm2, %v2431_v55  ;;  %v2486_v55 = vrot.slane %v2484_v10, 1  ;;  %v2482_v60 = vor.u32 %v2480_v41, %v2478_v43  ;;  %v3292_v10 = vcombine.low %v2754_v23, %v4450_v5 }
  0xa9   : > { %v2490_v63 = vor.u32 %v2488_v54, %v2486_v55  ;;  %v2487_v61 = vsel %vm250_vm1, %v2482_v60, %v2486_v55  ;;  %v4029_v54 = vld [vmem:[%s4098_s22 + $0x48] sm:$0xff]   ;;  %v2760_v46 = vrot.slane %v3292_v10, 1  ;;  %v2761_v55 = vrot.slane %v4463_v29, 1  ;;  %v4031_v60 = vld [vmem:[%s4098_s22 + $0x50] sm:$0xff]  }
  0xaa   : > { %v2765_v29 = vrot.slane %v4480_v47, 1  ;;  %v1479_v47 = vshrl.u32 %v4229_v50, 16  ;;  %v2771_v50 = vrot.slane %v4517_v57, 1  ;;  %v1523_v10 = vshll.u32 %v4378_v56, 16 }
  0xab   : > { %v2495_v16 = vsel %vm250_vm1, %v2490_v63, %v2494_v7  ;;  %v2762_v5 = vsel %vm741_vm3, %v2760_v46, %v2761_v55  ;;  %v4032_v63 = vld [vmem:[%s4098_s22 + $0x58] sm:$0xff]  }
  0xac   : > { %3523 = vmatmul.mubr.msk.bf16.gmra.mrb[16].mxu1 %vm367_vm2, %v762_v11  ;;  %v4560_v11 = vld [vmem:[%s4098_s22 + $0x68] sm:$0xff]  }
  0xad   : > { %3526 = vmatprep.mubr.msk.bf16.mxu1 %vm367_vm2, %v764_v15  ;;  %v2496_v15 = vshrl.u32 %v4542_v28, 16  ;;  %v2512_v48 = vshrl.u32 %v4560_v11, 16 }
  0xae   : > { %3657 = vmatmul.mubr.msk.bf16.vlgmr.msra.gmra.mrb[0].mxu0 %vm367_vm2, %v2439_v17  ;;  %v2504_v17 = vshrl.u32 %v4554_v34, 16 }
  0xaf   : > { %3685 = vmatpush3.bf16.msra.mxu0 %v2832_v20  ;;  %3660 = vmatprep.mubr.msk.bf16.mxu0 %vm367_vm2, %v2447_v22  ;;  %v2508_v20 = vshll.u32 %v4560_v11, 16  ;;  %v4573_v22 = vld [vmem:[%s4098_s22 + $0x70] sm:$0xff]   ;;  %v2498_v52 = vor.u32 %v2496_v15, %v2494_v7  ;;  %v2767_v15 = vrot.slane %v4495_v1, 1 }
  0xb0   : > { %v2506_v8 = vor.u32 %v2504_v17, %v2502_v6  ;;  %v2516_v53 = vshll.u32 %v4573_v22, 16  ;;  %v1483_v17 = vshll.u32 %v4333_v18, 16  ;;  %v4035_v1 = vld [vmem:[%s4098_s22 + $0x70] sm:$0xff]  }
  0xb1   : > { %v2510_v19 = vrot.slane %v2508_v20, 1  ;;  %v2768_v20 = vsel %vm741_vm3, %v2765_v29, %v2767_v15 }
  0xb3   : > { %v2511_v35 = vsel %vm250_vm1, %v2506_v8, %v2510_v19  ;;  %v2773_v8 = vrot.slane %v4522_v58, 1  ;;  %v1507_v58 = vshll.u32 %v4362_v45, 16 }
  0xb4   : > { %3527 = vmatmul.mubr.msk.bf16.gmra.mrb[20].mxu1 %vm367_vm2, %v766_v3  ;;  %v2503_v3 = vsel %vm250_vm1, %v2498_v52, %v2502_v6  ;;  %v1485_v52 = vrot.slane %v1483_v17, 1 }
  0xb5   : > { %3530 = vmatprep.mubr.msk.bf16.mxu1 %vm367_vm2, %v768_v0  ;;  %v2520_v0 = vshrl.u32 %v4573_v22, 16  ;;  %v2774_v57 = vsel %vm741_vm3, %v2771_v50, %v2773_v8  ;;  %v1509_v23 = vrot.slane %v1507_v58, 1 }
  0xb6   : > { %3661 = vmatmul.mubr.msk.bf16.gmra.mrb[4].mxu0 %vm367_vm2, %v2455_v13  ;;  %v2518_v13 = vrot.slane %v2516_v53, 1  ;;  %v1495_v53 = vshrl.u32 %v4348_v42, 16 }
  0xb7   : > { %3664 = vmatprep.mubr.msk.bf16.mxu0 %vm367_vm2, %v2463_v27  ;;  %v2514_v27 = vor.u32 %v2512_v48, %v2510_v19 }
  0xb8   : > { %v2522_v33 = vor.u32 %v2520_v0, %v2518_v13 }
  0xbc   : > { %3531 = vmatmul.mubr.msk.bf16.gmra.mrb[24].mxu1 %vm367_vm2, %v770_v36  ;;  %v2519_v36 = vsel %vm250_vm1, %v2514_v27, %v2518_v13  ;;  %v2777_v13 = vrot.slane %v4542_v28, 1 }
  0xbd   : > { %3536 = vmatprep.mubr.msk.bf16.mxu1 %vm367_vm2, %v4013_v37 }
  0xbe   : > { %3665 = vmatmul.mubr.msk.bf16.gmra.mrb[8].mxu0 %vm367_vm2, %v2471_v39  ;;  %v4027_v39 = vld [vmem:[%s4098_s22 + $0x40] sm:$0xff]  }
  0xbf   : > { %3668 = vmatprep.mubr.msk.bf16.mxu0 %vm367_vm2, %v2479_v49  ;;  %v2534_v49 = vrot.slane %v2532_v9, 1  ;;  %v2781_v9 = vrot.slane %v4560_v11, 1 }
  0xc4   : > { %3537 = vmatmul.mubr.msk.bf16.vlgmr.msra.gmra.mrb[0].mxu1 %vm367_vm2, %v4015_v59 }
  0xc5   : > { %3540 = vmatprep.mubr.msk.bf16.mxu1 %vm367_vm2, %v4017_v62  ;;  %3715 = vmatpush3.bf16.msra.mxu1 %v4080_v2  ;;  %v4579_v2 = vld [vmem:[%s4098_s22 + $0x78] sm:$0xff]   ;;  %v2763_v62 = vrot.slane %v4475_v40, 1  ;;  %v4034_v40 = vld [vmem:[%s4098_s22 + $0x68] sm:$0xff]  }
  0xc6   : > { %3669 = vmatmul.mubr.msk.bf16.gmra.mrb[12].mxu0 %vm367_vm2, %v2487_v61  ;;  %v2524_v38 = vshll.u32 %v4579_v2, 16  ;;  %v2528_v37 = vshrl.u32 %v4579_v2, 16  ;;  %v4033_v61 = vld [vmem:[%s4098_s22 + $0x60] sm:$0xff]   ;;  %v2785_v11 = vrot.slane %v4579_v2, 1 }
  0xc7   : > { %3672 = vmatprep.mubr.msk.bf16.mxu0 %vm367_vm2, %v2495_v16  ;;  %v2764_v7 = vsel %vm741_vm3, %v2761_v55, %v2763_v62  ;;  %v2766_v12 = vsel %vm741_vm3, %v2763_v62, %v2765_v29  ;;  %v2769_v16 = vrot.slane %v4500_v4, 1  ;;  %v1491_v4 = vshll.u32 %v4348_v42, 16 }
  0xc8   : > { %v2526_v14 = vrot.slane %v2524_v38, 1  ;;  %v2775_v42 = vrot.slane %v4536_v25, 1 }
  0xc9   : > { %v2770_v6 = vsel %vm741_vm3, %v2767_v15, %v2769_v16  ;;  %v1493_v48 = vrot.slane %v1491_v4, 1 }
  0xca   : > { %v2527_v43 = vsel %vm250_vm1, %v2522_v33, %v2526_v14  ;;  %v2530_v41 = vor.u32 %v2528_v37, %v2526_v14  ;;  %v1515_v33 = vshll.u32 %v4371_v51, 16  ;;  %v2776_v14 = vsel %vm741_vm3, %v2773_v8, %v2775_v42 }
  0xcb   : > { %v1497_v0 = vor.u32 %v1495_v53, %v1493_v48  ;;  %v2778_v25 = vsel %vm741_vm3, %v2775_v42, %v2777_v13 }
  0xcc   : > { %3541 = vmatmul.mubr.msk.bf16.gmra.mrb[4].mxu1 %vm367_vm2, %v4019_v24  ;;  %v2535_v59 = vsel %vm250_vm1, %v2530_v41, %v2534_v49  ;;  %v1481_v24 = vor.u32 %v1479_v47, %v4252_v21  ;;  %v1499_v21 = vshll.u32 %v4354_v44, 16  ;;  %v1517_v28 = vrot.slane %v1515_v33, 1 }
  0xcd   : > { %3544 = vmatprep.mubr.msk.bf16.mxu1 %vm367_vm2, %v4021_v32  ;;  %v1487_v32 = vshrl.u32 %v4333_v18, 16 }
  0xce   : > { %3673 = vmatmul.mubr.msk.bf16.gmra.mrb[16].mxu0 %vm367_vm2, %v2503_v3  ;;  %v1486_v19 = vsel %vm250_vm1, %v1481_v24, %v1485_v52  ;;  %v2772_v3 = vsel %vm741_vm3, %v2769_v16, %v2771_v50  ;;  %v1501_v18 = vrot.slane %v1499_v21, 1 }
  0xcf   : > { %3676 = vmatprep.mubr.msk.bf16.mxu0 %vm367_vm2, %v2511_v35  ;;  %v1489_v35 = vor.u32 %v1487_v32, %v1485_v52 }
  0xd0   : > { %v1502_v27 = vsel %vm250_vm1, %v1497_v0, %v1501_v18 }
  0xd1   : > { %v1494_v38 = vsel %vm250_vm1, %v1489_v35, %v1493_v48 }
  0xd4   : > { %3545 = vmatmul.mubr.msk.bf16.gmra.mrb[8].mxu1 %vm367_vm2, %v4023_v26  ;;  %v1503_v26 = vshrl.u32 %v4354_v44, 16  ;;  %v2779_v44 = vrot.slane %v4554_v34, 1  ;;  %v1525_v34 = vrot.slane %v1523_v10, 1 }
  0xd5   : > { %3548 = vmatprep.mubr.msk.bf16.mxu1 %vm367_vm2, %v4025_v31  ;;  %v1511_v31 = vshrl.u32 %v4362_v45, 16 }
  0xd6   : > { %3677 = vmatmul.mubr.msk.bf16.gmra.mrb[20].mxu0 %vm367_vm2, %v2519_v36  ;;  %v1505_v36 = vor.u32 %v1503_v26, %v1501_v18  ;;  %v2780_v41 = vsel %vm741_vm3, %v2777_v13, %v2779_v44  ;;  %v2782_v49 = vsel %vm741_vm3, %v2779_v44, %v2781_v9 }
  0xd7   : > { %3680 = vmatprep.mubr.msk.bf16.mxu0 %vm367_vm2, %v2527_v43  ;;  %v1513_v37 = vor.u32 %v1511_v31, %v1509_v23  ;;  %v1519_v43 = vshrl.u32 %v4371_v51, 16  ;;  %v2783_v51 = vrot.slane %v4573_v22, 1 }
  0xd8   : > { %v1510_v45 = vsel %vm250_vm1, %v1505_v36, %v1509_v23 }
  0xd9   : > { %v2784_v46 = vsel %vm741_vm3, %v2781_v9, %v2783_v51  ;;  %v2786_v55 = vsel %vm741_vm3, %v2783_v51, %v2785_v11 }
  0xdc   : > { %3549 = vmatmul.mubr.msk.bf16.gmra.mrb[12].mxu1 %vm367_vm2, %v4027_v39  ;;  %v1518_v39 = vsel %vm250_vm1, %v1513_v37, %v1517_v28 }
  0xdd   : > { %3552 = vmatprep.mubr.msk.bf16.mxu1 %vm367_vm2, %v4029_v54  ;;  %v1521_v54 = vor.u32 %v1519_v43, %v1517_v28 }
  0xde   : > { %3681 = vmatmul.mubr.msk.bf16.gmra.mrb[24].mxu0 %vm367_vm2, %v2535_v59  ;;  %v2787_v59 = vrot.slane %v4593_v30, 1 }
  0xdf   : > { %3686 = vmatprep.mubr.msk.bf16.mxu0 %vm367_vm2, %v2762_v5  ;;  %v1526_v56 = vsel %vm250_vm1, %v1521_v54, %v1525_v34 }
  0xe0   : > { %v2788_v5 = vsel %vm741_vm3, %v2785_v11, %v2787_v59 }
  0xe4   : > { %3553 = vmatmul.mubr.msk.bf16.gmra.mrb[16].mxu1 %vm367_vm2, %v4031_v60 }
  0xe5   : > { %3556 = vmatprep.mubr.msk.bf16.mxu1 %vm367_vm2, %v4032_v63 }
  0xe6   : > { %3687 = vmatmul.mubr.msk.bf16.vlgmr.msra.gmra.mrb[0].mxu0 %vm367_vm2, %v2764_v7 }
  0xe7   : > { %3690 = vmatprep.mubr.msk.bf16.mxu0 %vm367_vm2, %v2766_v12 }
  0xec   : > { %3557 = vmatmul.mubr.msk.bf16.gmra.mrb[20].mxu1 %vm367_vm2, %v4033_v61 }
  0xed   : > { %3560 = vmatprep.mubr.msk.bf16.mxu1 %vm367_vm2, %v4034_v40 }
  0xee   : > { %3691 = vmatmul.mubr.msk.bf16.gmra.mrb[4].mxu0 %vm367_vm2, %v2768_v20 }
  0xef   : > { %3694 = vmatprep.mubr.msk.bf16.mxu0 %vm367_vm2, %v2770_v6 }
  0xf4   : > { %3561 = vmatmul.mubr.msk.bf16.gmra.mrb[24].mxu1 %vm367_vm2, %v4035_v1 }
  0xf5   : > { %3582 = vmatprep.mubr.msk.bf16.mxu1 %vm367_vm2, %v1486_v19 }
  0xf6   : > { %3695 = vmatmul.mubr.msk.bf16.gmra.mrb[8].mxu0 %vm367_vm2, %v2772_v3 }
  0xf7   : > { %3698 = vmatprep.mubr.msk.bf16.mxu0 %vm367_vm2, %v2774_v57 }
  0xfc   : > { %3583 = vmatmul.mubr.msk.bf16.vlgmr.msra.gmra.mrb[16].mxu1 %vm367_vm2, %v1494_v38 }
  0xfd   : > { %3586 = vmatprep.mubr.msk.bf16.mxu1 %vm367_vm2, %v1502_v27 }
  0xfe   : > { %3699 = vmatmul.mubr.msk.bf16.gmra.mrb[12].mxu0 %vm367_vm2, %v2776_v14 }
  0xff   : > { %3702 = vmatprep.mubr.msk.bf16.mxu0 %vm367_vm2, %v2778_v25 }
 0x104   : > { %3587 = vmatmul.mubr.msk.bf16.gmra.mrb[20].mxu1 %vm367_vm2, %v1510_v45 }
 0x105   : > { %3590 = vmatprep.mubr.msk.bf16.mxu1 %vm367_vm2, %v1518_v39 }
 0x106   : > { %3703 = vmatmul.mubr.msk.bf16.gmra.mrb[16].mxu0 %vm367_vm2, %v2780_v41 }
 0x107   : > { %3706 = vmatprep.mubr.msk.bf16.mxu0 %vm367_vm2, %v2782_v49 }
 0x10c   : > { %3591 = vmatmul.mubr.msk.bf16.gmra.mrb[24].mxu1 %vm367_vm2, %v1526_v56 }
 0x10e   : > { %3707 = vmatmul.mubr.msk.bf16.gmra.mrb[20].mxu0 %vm367_vm2, %v2784_v46 }
 0x10f   : > { %3710 = vmatprep.mubr.msk.bf16.mxu0 %vm367_vm2, %v2786_v55 }
 0x116   : > { %3711 = vmatmul.mubr.msk.bf16.gmra.mrb[24].mxu0 %vm367_vm2, %v2788_v5 }
 0x197   : > { %v3538_v22 = vpop.f32.mrb[0].mxu1 }
 0x198   : > { %v1168_v60 = vpop.f32.mrb[1].mxu1 }
 0x199   : > { %v3539_v2 = vpop.f32.mrb[2].mxu1 }
 0x19a   : > { %v1171_v62 = vpop.f32.mrb[3].mxu1 }
 0x19f   : > { %v3542_v63 = vpop.f32.mrb[4].mxu1 }
 0x1a0   : > { %v1184_v29 = vpop.f32.mrb[5].mxu1 }
 0x1a1   : > { %v3543_v7 = vpop.f32.mrb[6].mxu1 }
 0x1a2   : > { %v1187_v12 = vpop.f32.mrb[7].mxu1 }
 0x1a7   : > { %v3546_v61 = vpop.f32.mrb[8].mxu1 }
 0x1a8   : > { %v1200_v15 = vpop.f32.mrb[9].mxu1 }
 0x1a9   : > { %v3547_v40 = vpop.f32.mrb[10].mxu1 }
 0x1aa   : > { %v1203_v16 = vpop.f32.mrb[11].mxu1 }
 0x1af   : > { %v3550_v47 = vpop.f32.mrb[12].mxu1 }
 0x1b0   : > { %v1216_v17 = vpop.f32.mrb[13].mxu1 }
 0x1b1   : > { %v3551_v30 = vpop.f32.mrb[14].mxu1 }
 0x1b2   : > { %v1219_v20 = vpop.f32.mrb[15].mxu1 }
 0x1b9   : > { %v3688_v6 = vpop.f32.mrb[0].mxu0 }
 0x1ba   : > { %v3716_v24 = vadd.f32 %v3688_v6, %v3538_v22  ;;  %v2868_v52 = vpop.f32.mrb[1].mxu0 }
 0x1bb   : > { %v3717_v1 = vadd.f32 %v2868_v52, %v1168_v60  ;;  %v3689_v50 = vpop.f32.mrb[2].mxu0 }
 0x1bc   : > { %3009 = vst [vmem:[%s4693_s8 + $0x10] sm:$0xff] %v3716_v24  ;;  %v3718_v4 = vadd.f32 %v3689_v50, %v3539_v2  ;;  %v2871_v32 = vpop.f32.mrb[3].mxu0 }
 0x1bd   : > { %3007 = vst [vmem:[%s4693_s8] sm:$0xff] %v3717_v1  ;;  %v3719_v8 = vadd.f32 %v2871_v32, %v1171_v62 }
 0x1be   : > { %3010 = vst [vmem:[%s4693_s8 + $0x18] sm:$0xff] %v3718_v4 }
 0x1bf   : > { %3008 = vst [vmem:[%s4693_s8 + $0x8] sm:$0xff] %v3719_v8 }
 0x1c1   : > { %v3692_v19 = vpop.f32.mrb[4].mxu0 }
 0x1c2   : > { %v3720_v53 = vadd.f32 %v3692_v19, %v3542_v63  ;;  %v2884_v21 = vpop.f32.mrb[5].mxu0 }
 0x1c3   : > { %v3721_v3 = vadd.f32 %v2884_v21, %v1184_v29  ;;  %v3693_v48 = vpop.f32.mrb[6].mxu0 }
 0x1c4   : > { %3013 = vst [vmem:[%s4693_s8 + $0x30] sm:$0xff] %v3720_v53  ;;  %v3722_v35 = vadd.f32 %v3693_v48, %v3543_v7  ;;  %v2887_v57 = vpop.f32.mrb[7].mxu0 }
 0x1c5   : > { %3011 = vst [vmem:[%s4693_s8 + $0x20] sm:$0xff] %v3721_v3  ;;  %v3723_v0 = vadd.f32 %v2887_v57, %v1187_v12 }
 0x1c6   : > { %3014 = vst [vmem:[%s4693_s8 + $0x38] sm:$0xff] %v3722_v35 }
 0x1c7   : > { %3012 = vst [vmem:[%s4693_s8 + $0x28] sm:$0xff] %v3723_v0 }
 0x1c9   : > { %v3696_v18 = vpop.f32.mrb[8].mxu0 }
 0x1ca   : > { %v3724_v42 = vadd.f32 %v3696_v18, %v3546_v61  ;;  %v2900_v58 = vpop.f32.mrb[9].mxu0 }
 0x1cb   : > { %v3725_v38 = vadd.f32 %v2900_v58, %v1200_v15  ;;  %v3697_v13 = vpop.f32.mrb[10].mxu0 }
 0x1cc   : > { %3017 = vst [vmem:[%s4693_s8 + $0x50] sm:$0xff] %v3724_v42  ;;  %v3726_v26 = vadd.f32 %v3697_v13, %v3547_v40  ;;  %v2903_v27 = vpop.f32.mrb[11].mxu0 }
 0x1cd   : > { %3015 = vst [vmem:[%s4693_s8 + $0x40] sm:$0xff] %v3725_v38  ;;  %v3727_v31 = vadd.f32 %v2903_v27, %v1203_v16 }
 0x1ce   : > { %3018 = vst [vmem:[%s4693_s8 + $0x58] sm:$0xff] %v3726_v26 }
 0x1cf   : > { %v3584_v33 = vpop.f32.mrb[16].mxu1  ;;  %3016 = vst [vmem:[%s4693_s8 + $0x48] sm:$0xff] %v3727_v31 }
 0x1d0   : > { %v1670_v14 = vpop.f32.mrb[17].mxu1 }
 0x1d1   : > { %v3585_v23 = vpop.f32.mrb[18].mxu1  ;;  %v3700_v25 = vpop.f32.mrb[12].mxu0 }
 0x1d2   : > { %v1673_v36 = vpop.f32.mrb[19].mxu1  ;;  %v3728_v37 = vadd.f32 %v3700_v25, %v3550_v47  ;;  %v2916_v28 = vpop.f32.mrb[13].mxu0 }
 0x1d3   : > { %v3729_v44 = vadd.f32 %v2916_v28, %v1216_v17  ;;  %v3701_v45 = vpop.f32.mrb[14].mxu0 }
 0x1d4   : > { %3021 = vst [vmem:[%s4693_s8 + $0x70] sm:$0xff] %v3728_v37  ;;  %v3730_v9 = vadd.f32 %v3701_v45, %v3551_v30  ;;  %v2919_v43 = vpop.f32.mrb[15].mxu0 }
 0x1d5   : > { %3019 = vst [vmem:[%s4693_s8 + $0x60] sm:$0xff] %v3729_v44  ;;  %v3731_v10 = vadd.f32 %v2919_v43, %v1219_v20 }
 0x1d6   : > { %3022 = vst [vmem:[%s4693_s8 + $0x78] sm:$0xff] %v3730_v9 }
 0x1d7   : > { %v3588_v39 = vpop.f32.mrb[20].mxu1  ;;  %3020 = vst [vmem:[%s4693_s8 + $0x68] sm:$0xff] %v3731_v10 }
 0x1d8   : > { %v1686_v41 = vpop.f32.mrb[21].mxu1 }
 0x1d9   : > { %v3589_v49 = vpop.f32.mrb[22].mxu1  ;;  %v3704_v54 = vpop.f32.mrb[16].mxu0 }
 0x1da   : > { %v1689_v34 = vpop.f32.mrb[23].mxu1  ;;  %v3732_v51 = vadd.f32 %v3704_v54, %v3584_v33  ;;  %v2932_v56 = vpop.f32.mrb[17].mxu0 }
 0x1db   : > { %v3733_v11 = vadd.f32 %v2932_v56, %v1670_v14  ;;  %v3705_v46 = vpop.f32.mrb[18].mxu0 }
 0x1dc   : > { %3025 = vst [vmem:[%s4693_s8 + $0x90] sm:$0xff] %v3732_v51  ;;  %v3734_v55 = vadd.f32 %v3705_v46, %v3585_v23  ;;  %v2935_v59 = vpop.f32.mrb[19].mxu0 }
 0x1dd   : > { %3023 = vst [vmem:[%s4693_s8 + $0x80] sm:$0xff] %v3733_v11  ;;  %v3735_v5 = vadd.f32 %v2935_v59, %v1673_v36 }
 0x1de   : > { %3026 = vst [vmem:[%s4693_s8 + $0x98] sm:$0xff] %v3734_v55 }
 0x1df   : > { %v3592_v22 = vpop.f32.mrb[24].mxu1  ;;  %3024 = vst [vmem:[%s4693_s8 + $0x88] sm:$0xff] %v3735_v5 }
 0x1e0   : > { %v1702_v60 = vpop.f32.mrb[25].mxu1 }
 0x1e1   : > { %v3593_v2 = vpop.f32.mrb[26].mxu1  ;;  %v3708_v62 = vpop.f32.mrb[20].mxu0 }
 0x1e2   : > { %v1705_v63 = vpop.f32.mrb[27].mxu1  ;;  %v3736_v29 = vadd.f32 %v3708_v62, %v3588_v39  ;;  %v2948_v7 = vpop.f32.mrb[21].mxu0 }
 0x1e3   : > { %v3737_v12 = vadd.f32 %v2948_v7, %v1686_v41  ;;  %v3709_v61 = vpop.f32.mrb[22].mxu0 }
 0x1e4   : > { %3029 = vst [vmem:[%s4693_s8 + $0xb0] sm:$0xff] %v3736_v29  ;;  %v3738_v15 = vadd.f32 %v3709_v61, %v3589_v49  ;;  %v2951_v40 = vpop.f32.mrb[23].mxu0 }
 0x1e5   : > { %3027 = vst [vmem:[%s4693_s8 + $0xa0] sm:$0xff] %v3737_v12  ;;  %v3739_v16 = vadd.f32 %v2951_v40, %v1689_v34 }
 0x1e6   : > { %3030 = vst [vmem:[%s4693_s8 + $0xb8] sm:$0xff] %v3738_v15 }
 0x1e7   : > { %3028 = vst [vmem:[%s4693_s8 + $0xa8] sm:$0xff] %v3739_v16 }
 0x1e9   : > { %v3712_v47 = vpop.f32.mrb[24].mxu0 }
 0x1ea   : > { %v3740_v17 = vadd.f32 %v3712_v47, %v3592_v22  ;;  %v2964_v30 = vpop.f32.mrb[25].mxu0 }
 0x1eb   : > { %v3741_v20 = vadd.f32 %v2964_v30, %v1702_v60  ;;  %v3713_v6 = vpop.f32.mrb[26].mxu0 }
 0x1ec   : > { %3033 = vst [vmem:[%s4693_s8 + $0xd0] sm:$0xff] %v3740_v17  ;;  %v3742_v24 = vadd.f32 %v3713_v6, %v3593_v2  ;;  %v2967_v52 = vpop.f32.mrb[27].mxu0 }
 0x1ed   : > { %3031 = vst [vmem:[%s4693_s8 + $0xc0] sm:$0xff] %v3741_v20  ;;  %v3743_v1 = vadd.f32 %v2967_v52, %v1705_v63 }
 0x1ee   : > { %3034 = vst [vmem:[%s4693_s8 + $0xd8] sm:$0xff] %v3742_v24 }
 0x1ef   : > { %3032 = vst [vmem:[%s4693_s8 + $0xc8] sm:$0xff] %v3743_v1 }
 0x1f0 PF: > { %s12_s9 = sadd.s32 1, %s4042_s9  }
 0x1f1   : > { %p9_p4 = scmp.ge.s32.totalorder %s12_s9, 4  }
 0x1f3   :  { %11 = sbr.rel (!%p9_p4) target bundleno = 1 (0x1), region = 66 }

</bundles_post_ra>
